<compile_context>
chip_gen: v7x
topology: tpu7x:2x2x1
jax: 0.10.0
libtpu: 0.0.40
codegen_flags: <defaults>
</compile_context>

<pallas_src>
import functools

import jax
import jax.numpy as jnp
from jax.experimental import pallas as pl
from jax.experimental.pallas import tpu as pltpu

_NEG_SLOPE = 0.01          # torch.nn.functional.leaky_relu default
_TB_MAX = 8192             # lane-tile upper bound (amortizes ~0.35us/step)
_TB_ALIGN = 512            # keeps 128-wide (v5e) and 256-wide (v6e/v7x) MXU N full


def _leaky_relu(x):
    # max(x, a*x) == leaky_relu(x) for 0 < a < 1; 2 VALU ops vs 3 for where().
    return jnp.maximum(x, _NEG_SLOPE * x)


def _round_up(n, m):
    return ((n + m - 1) // m) * m


def surrogate_net_kernel(x_ref,
                         w1_ref, b1_ref,
                         w2_ref, b2_ref,
                         w3_ref, b3_ref,
                         w4_ref, b4_ref,
                         o_ref,
                         *, mxu_dtype):
    # Batch lives on the lane (last) axis of every operand.
    x = x_ref[...]                                   # (4, TB)  f32

    # Layer 1 (4 -> 32) on the MXU.  K=4 wastes most of a pass, but the MXU
    # slot has slack while the VALU is the binding unit, so it's free.
    h = jnp.dot(w1_ref[...], x.astype(mxu_dtype),
                preferred_element_type=jnp.float32) + b1_ref[...]   # (32, TB)
    h = _leaky_relu(h)

    # Layer 2 (32 -> 64) and layer 3 (64 -> 32).
    h = jnp.dot(w2_ref[...], h.astype(mxu_dtype),
                preferred_element_type=jnp.float32) + b2_ref[...]   # (64, TB)
    h = _leaky_relu(h)
    h = jnp.dot(w3_ref[...], h.astype(mxu_dtype),
                preferred_element_type=jnp.float32) + b3_ref[...]   # (32, TB)
    h = _leaky_relu(h)

    # Layer 4 (32 -> 1): single output row -> elementwise multiply + sublane
    # reduction (XLU slot, free); f32 accumulation.
    out = jnp.sum(w4_ref[...] * h, axis=0, keepdims=True) + b4_ref[...]  # (1, TB)
    o_ref[...] = out.astype(o_ref.dtype)


def _choose_tiling(B, tb=None):
    """Balanced lane tiles: minimal tail padding, >=2 tiles for v7x megacore."""
    if tb is not None:
        tb = _round_up(max(tb, 128), 128)
        return tb, pl.cdiv(B, tb)
    n_tiles = pl.cdiv(B, _TB_MAX)
    if n_tiles == 1 and B > _TB_ALIGN:
        n_tiles = 2                      # keep v7x's second TensorCore busy
    tb = _round_up(pl.cdiv(B, n_tiles), _TB_ALIGN)
    return tb, n_tiles


def surrogate_net_forward_lanes(xt, params, *, tb=None, mxu_dtype=jnp.bfloat16):
    """Batch-on-lanes entry point.

    xt: (4, B) float32 (feature-major).  Returns (1, B) float32.
    Use this from producers that can supply the transposed layout directly —
    it skips the wrapper-side transpose HBM passes.
    """
    F, B = xt.shape
    assert F == 4, xt.shape

    tb, n_tiles = _choose_tiling(B, tb)
    b_pad = n_tiles * tb
    grid = (n_tiles,)

    xt = xt.astype(jnp.float32)
    if b_pad != B:
        xt = jnp.pad(xt, ((0, 0), (0, b_pad - B)))   # zero-pad ragged tail

    # PyTorch nn.Linear layout: weight (out, in), bias (out,).
    w1 = params["w1"].astype(mxu_dtype)                      # (32, 4)
    b1 = params["b1"].astype(jnp.float32).reshape(-1, 1)     # (32, 1)
    w2 = params["w2"].astype(mxu_dtype)                      # (64, 32)
    b2 = params["b2"].astype(jnp.float32).reshape(-1, 1)     # (64, 1)
    w3 = params["w3"].astype(mxu_dtype)                      # (32, 64)
    b3 = params["b3"].astype(jnp.float32).reshape(-1, 1)     # (32, 1)
    w4 = params["w4"].astype(jnp.float32).T                  # (1,32) -> (32, 1)
    b4 = params["b4"].astype(jnp.float32).reshape(1, 1)      # (1, 1)

    def const_full(a):
        # Weights/biases: full block, constant block index -> stay resident in
        # VMEM across all batch tiles (no re-DMA per grid step).
        return pl.BlockSpec(a.shape, lambda i: (0, 0))

    out = pl.pallas_call(
        functools.partial(surrogate_net_kernel, mxu_dtype=mxu_dtype),
        out_shape=jax.ShapeDtypeStruct((1, b_pad), jnp.float32),
        grid=grid,
        in_specs=[pl.BlockSpec((4, tb), lambda i: (0, i)),
                  const_full(w1), const_full(b1),
                  const_full(w2), const_full(b2),
                  const_full(w3), const_full(b3),
                  const_full(w4), const_full(b4)],
        out_specs=pl.BlockSpec((1, tb), lambda i: (0, i)),
        compiler_params=pltpu.CompilerParams(
            dimension_semantics=("parallel",),
            vmem_limit_bytes=32 * 1024 * 1024),   # explicit: safe on v7x's 64 MiB
    )(xt, w1, b1, w2, b2, w3, b3, w4, b4)

    if b_pad != B:
        out = out[:, :B]
    return out


def surrogate_net_forward(x, params, *, tb=None, mxu_dtype=jnp.bfloat16):
    """x: (B, 4) float32. Returns (B, 1) float32 (PyTorch-compatible layout)."""
    B, F = x.shape
    assert F == 4, x.shape
    # TODO(synk): producers that can supply (4, B) / consume (1, B) should call
    # surrogate_net_forward_lanes directly to avoid these transpose HBM passes.
    out = surrogate_net_forward_lanes(x.astype(jnp.float32).T, params,
                                      tb=tb, mxu_dtype=mxu_dtype)
    return out.T                                    # (B, 1)


def init_params(key):
    """PyTorch nn.Linear init: weight (out, in), bias (out,), U(-1/sqrt(in), 1/sqrt(in))."""
    dims = [(4, 32), (32, 64), (64, 32), (32, 1)]
    params = {}
    for i, (fan_in, fan_out) in enumerate(dims, start=1):
        key, kw, kb = jax.random.split(key, 3)
        bound = 1.0 / (fan_in ** 0.5)
        params[f"w{i}"] = jax.random.uniform(
            kw, (fan_out, fan_in), jnp.float32, minval=-bound, maxval=bound)
        params[f"b{i}"] = jax.random.uniform(
            kb, (fan_out,), jnp.float32, minval=-bound, maxval=bound)
    return params


def reference_forward(x, params):
    h = x
    for i in (1, 2, 3):
        h = _leaky_relu(h @ params[f"w{i}"].T + params[f"b{i}"])
    return h @ params["w4"].T + params["b4"]


if __name__ == "__main__":
    key = jax.random.PRNGKey(0)
    key, kx1, kx2 = jax.random.split(key, 3)
    params = init_params(key)

    # 1) Small batch, exact f32 MXU operands (single 512-lane tile, grid=(1,)).
    B1 = 8
    x1 = jax.random.normal(kx1, (B1, 4), jnp.float32)
    out1 = jax.block_until_ready(
        surrogate_net_forward(x1, params, mxu_dtype=jnp.float32))
    ref1 = reference_forward(x1, params)
    assert out1.shape == (B1, 1), out1.shape
    assert jnp.allclose(out1, ref1, atol=1e-5, rtol=1e-5)

    # 2) Multi-tile ragged batch (grid=(2,), balanced 512-lane tiles, zero-padded
    #    tail), default bf16 MXU operands (f32 accumulation) -> looser tolerance.
    B2 = 700
    x2 = jax.random.normal(kx2, (B2, 4), jnp.float32)
    out2 = jax.block_until_ready(surrogate_net_forward(x2, params))
    ref2 = reference_forward(x2, params)
    assert out2.shape == (B2, 1), out2.shape
    assert jnp.allclose(out2, ref2, atol=3e-2, rtol=3e-2)

    # 3) Batch-on-lanes entry point (no wrapper transpose passes).
    out3 = jax.block_until_ready(
        surrogate_net_forward_lanes(x1.T, params, mxu_dtype=jnp.float32))
    assert out3.shape == (1, B1), out3.shape
    assert jnp.allclose(out3.T, ref1, atol=1e-5, rtol=1e-5)

    print("KERNEL_OK")
</pallas_src>

<mosaic_0001>
module attributes {stable_mosaic.version = 11 : i64} {
  func.func @surrogate_net_kernel(%arg0: i32, %arg1: memref<4x512xf32, #tpu.memory_space<vmem>>, %arg2: memref<32x4xf32, #tpu.memory_space<vmem>>, %arg3: memref<32x1xf32, #tpu.memory_space<vmem>>, %arg4: memref<64x32xf32, #tpu.memory_space<vmem>>, %arg5: memref<64x1xf32, #tpu.memory_space<vmem>>, %arg6: memref<32x64xf32, #tpu.memory_space<vmem>>, %arg7: memref<32x1xf32, #tpu.memory_space<vmem>>, %arg8: memref<32x1xf32, #tpu.memory_space<vmem>>, %arg9: memref<1x1xf32, #tpu.memory_space<vmem>>, %arg10: memref<1x512xf32, #tpu.memory_space<vmem>>) attributes {dimension_semantics = [#tpu.dimension_semantics<parallel>], iteration_bounds = array<i64: 1>, scalar_prefetch = 0 : i64, scratch_operands = 0 : i64, tpu.core_type = #tpu.core_type<tc>, window_params = [{transform_indices = @transform_0, window_bounds = array<i64: 4, 512>}, {pipeline_mode = #tpu.pipeline_mode<synchronous>, transform_indices = @transform_1, window_bounds = array<i64: 32, 4>}, {pipeline_mode = #tpu.pipeline_mode<synchronous>, transform_indices = @transform_2, window_bounds = array<i64: 32, 1>}, {pipeline_mode = #tpu.pipeline_mode<synchronous>, transform_indices = @transform_3, window_bounds = array<i64: 64, 32>}, {pipeline_mode = #tpu.pipeline_mode<synchronous>, transform_indices = @transform_4, window_bounds = array<i64: 64, 1>}, {pipeline_mode = #tpu.pipeline_mode<synchronous>, transform_indices = @transform_5, window_bounds = array<i64: 32, 64>}, {pipeline_mode = #tpu.pipeline_mode<synchronous>, transform_indices = @transform_6, window_bounds = array<i64: 32, 1>}, {pipeline_mode = #tpu.pipeline_mode<synchronous>, transform_indices = @transform_7, window_bounds = array<i64: 32, 1>}, {pipeline_mode = #tpu.pipeline_mode<synchronous>, transform_indices = @transform_8, window_bounds = array<i64: 1, 1>}, {transform_indices = @transform_9, window_bounds = array<i64: 1, 512>}]} {
    %c0 = arith.constant 0 : index
    %c0_0 = arith.constant 0 : index
    %0 = vector.load %arg1[%c0, %c0_0] : memref<4x512xf32, #tpu.memory_space<vmem>>, vector<4x512xf32>
    %c0_1 = arith.constant 0 : index
    %c0_2 = arith.constant 0 : index
    %1 = vector.load %arg2[%c0_1, %c0_2] : memref<32x4xf32, #tpu.memory_space<vmem>>, vector<32x4xf32>
    %cst = arith.constant dense<0.000000e+00> : vector<32x512xf32>
    %2 = tpu.matmul %1, %0, %cst {dimension_numbers = #tpu.dot_dimension_numbers<[1], [0], [0], [1], [0, 0, 1, 1], [], []>} : vector<32x4xf32>, vector<4x512xf32>, vector<32x512xf32> -> vector<32x512xf32>
    %c0_3 = arith.constant 0 : index
    %c0_4 = arith.constant 0 : index
    %3 = vector.load %arg3[%c0_3, %c0_4] : memref<32x1xf32, #tpu.memory_space<vmem>>, vector<32x1xf32>
    %4 = vector.broadcast %3 : vector<32x1xf32> to vector<32x512xf32>
    %5 = arith.addf %2, %4 : vector<32x512xf32>
    %cst_5 = arith.constant 0.00999999977 : f32
    %6 = vector.broadcast %cst_5 : f32 to vector<32x512xf32>
    %7 = arith.mulf %6, %5 : vector<32x512xf32>
    %8 = arith.maximumf %5, %7 : vector<32x512xf32>
    %c0_6 = arith.constant 0 : index
    %c0_7 = arith.constant 0 : index
    %9 = vector.load %arg4[%c0_6, %c0_7] : memref<64x32xf32, #tpu.memory_space<vmem>>, vector<64x32xf32>
    %cst_8 = arith.constant dense<0.000000e+00> : vector<64x512xf32>
    %10 = tpu.matmul %9, %8, %cst_8 {dimension_numbers = #tpu.dot_dimension_numbers<[1], [0], [0], [1], [0, 0, 1, 1], [], []>} : vector<64x32xf32>, vector<32x512xf32>, vector<64x512xf32> -> vector<64x512xf32>
    %c0_9 = arith.constant 0 : index
    %c0_10 = arith.constant 0 : index
    %11 = vector.load %arg5[%c0_9, %c0_10] : memref<64x1xf32, #tpu.memory_space<vmem>>, vector<64x1xf32>
    %12 = vector.broadcast %11 : vector<64x1xf32> to vector<64x512xf32>
    %13 = arith.addf %10, %12 : vector<64x512xf32>
    %cst_11 = arith.constant 0.00999999977 : f32
    %14 = vector.broadcast %cst_11 : f32 to vector<64x512xf32>
    %15 = arith.mulf %14, %13 : vector<64x512xf32>
    %16 = arith.maximumf %13, %15 : vector<64x512xf32>
    %c0_12 = arith.constant 0 : index
    %c0_13 = arith.constant 0 : index
    %17 = vector.load %arg6[%c0_12, %c0_13] : memref<32x64xf32, #tpu.memory_space<vmem>>, vector<32x64xf32>
    %cst_14 = arith.constant dense<0.000000e+00> : vector<32x512xf32>
    %18 = tpu.matmul %17, %16, %cst_14 {dimension_numbers = #tpu.dot_dimension_numbers<[1], [0], [0], [1], [0, 0, 1, 1], [], []>} : vector<32x64xf32>, vector<64x512xf32>, vector<32x512xf32> -> vector<32x512xf32>
    %c0_15 = arith.constant 0 : index
    %c0_16 = arith.constant 0 : index
    %19 = vector.load %arg7[%c0_15, %c0_16] : memref<32x1xf32, #tpu.memory_space<vmem>>, vector<32x1xf32>
    %20 = vector.broadcast %19 : vector<32x1xf32> to vector<32x512xf32>
    %21 = arith.addf %18, %20 : vector<32x512xf32>
    %cst_17 = arith.constant 0.00999999977 : f32
    %22 = vector.broadcast %cst_17 : f32 to vector<32x512xf32>
    %23 = arith.mulf %22, %21 : vector<32x512xf32>
    %24 = arith.maximumf %21, %23 : vector<32x512xf32>
    %c0_18 = arith.constant 0 : index
    %c0_19 = arith.constant 0 : index
    %25 = vector.load %arg8[%c0_18, %c0_19] : memref<32x1xf32, #tpu.memory_space<vmem>>, vector<32x1xf32>
    %26 = vector.broadcast %25 : vector<32x1xf32> to vector<32x512xf32>
    %27 = arith.mulf %26, %24 : vector<32x512xf32>
    %cst_20 = arith.constant dense<0.000000e+00> : vector<512xf32>
    %28 = vector.multi_reduction <add>, %27, %cst_20 [0] : vector<32x512xf32> to vector<512xf32>
    %29 = vector.shape_cast %28 : vector<512xf32> to vector<1x512xf32>
    %c0_21 = arith.constant 0 : index
    %c0_22 = arith.constant 0 : index
    %30 = vector.load %arg9[%c0_21, %c0_22] : memref<1x1xf32, #tpu.memory_space<vmem>>, vector<1x1xf32>
    %31 = vector.broadcast %30 : vector<1x1xf32> to vector<1x512xf32>
    %32 = arith.addf %29, %31 : vector<1x512xf32>
    %c0_23 = arith.constant 0 : index
    %c0_24 = arith.constant 0 : index
    %33 = vector.load %arg10[%c0_23, %c0_24] : memref<1x512xf32, #tpu.memory_space<vmem>>, vector<1x512xf32>
    tpu.vector_store %arg10[%c0_23, %c0_24], %32 {strides = array<i32>} : memref<1x512xf32, #tpu.memory_space<vmem>>, vector<1x512xf32>,
    return
  }
  func.func @transform_0(%arg0: i32) -> (i32, i32) {
    %c0_i32 = arith.constant 0 : i32
    %c0_i32_0 = arith.constant 0 : i32
    return %c0_i32, %arg0 : i32, i32
  }
  func.func @transform_1(%arg0: i32) -> (i32, i32) {
    %c0_i32 = arith.constant 0 : i32
    %c0_i32_0 = arith.constant 0 : i32
    %c0_i32_1 = arith.constant 0 : i32
    return %c0_i32, %c0_i32_0 : i32, i32
  }
  func.func @transform_2(%arg0: i32) -> (i32, i32) {
    %c0_i32 = arith.constant 0 : i32
    %c0_i32_0 = arith.constant 0 : i32
    %c0_i32_1 = arith.constant 0 : i32
    return %c0_i32, %c0_i32_0 : i32, i32
  }
  func.func @transform_3(%arg0: i32) -> (i32, i32) {
    %c0_i32 = arith.constant 0 : i32
    %c0_i32_0 = arith.constant 0 : i32
    %c0_i32_1 = arith.constant 0 : i32
    return %c0_i32, %c0_i32_0 : i32, i32
  }
  func.func @transform_4(%arg0: i32) -> (i32, i32) {
    %c0_i32 = arith.constant 0 : i32
    %c0_i32_0 = arith.constant 0 : i32
    %c0_i32_1 = arith.constant 0 : i32
    return %c0_i32, %c0_i32_0 : i32, i32
  }
  func.func @transform_5(%arg0: i32) -> (i32, i32) {
    %c0_i32 = arith.constant 0 : i32
    %c0_i32_0 = arith.constant 0 : i32
    %c0_i32_1 = arith.constant 0 : i32
    return %c0_i32, %c0_i32_0 : i32, i32
  }
  func.func @transform_6(%arg0: i32) -> (i32, i32) {
    %c0_i32 = arith.constant 0 : i32
    %c0_i32_0 = arith.constant 0 : i32
    %c0_i32_1 = arith.constant 0 : i32
    return %c0_i32, %c0_i32_0 : i32, i32
  }
  func.func @transform_7(%arg0: i32) -> (i32, i32) {
    %c0_i32 = arith.constant 0 : i32
    %c0_i32_0 = arith.constant 0 : i32
    %c0_i32_1 = arith.constant 0 : i32
    return %c0_i32, %c0_i32_0 : i32, i32
  }
  func.func @transform_8(%arg0: i32) -> (i32, i32) {
    %c0_i32 = arith.constant 0 : i32
    %c0_i32_0 = arith.constant 0 : i32
    %c0_i32_1 = arith.constant 0 : i32
    return %c0_i32, %c0_i32_0 : i32, i32
  }
  func.func @transform_9(%arg0: i32) -> (i32, i32) {
    %c0_i32 = arith.constant 0 : i32
    %c0_i32_0 = arith.constant 0 : i32
    return %c0_i32, %arg0 : i32, i32
  }
}

</mosaic_0001>

<bundles_post_ra>
// kernel: tpu_custom_call.1
= control target key start
LH: loop header
LB: loop body
LE: loop exit
PB: predicated region body
PF: predicated region fallthrough
CT: control target
= control target key end

     0   :  { %s1430_s0 = inlined_call_operand.vmem [shape: f32[4,512], index: 0, kind: input, shape index: {}]   ;;  %s1431_s1 = inlined_call_operand.vmem [shape: f32[32,4], index: 1, kind: input, shape index: {}]   ;;  %s1432_s2 = inlined_call_operand.vmem [shape: f32[32,1], index: 2, kind: input, shape index: {}]   ;;  %s1433_s3 = inlined_call_operand.vmem [shape: f32[64,32], index: 3, kind: input, shape index: {}]   ;;  %s1434_s4 = inlined_call_operand.vmem [shape: f32[64,1], index: 4, kind: input, shape index: {}]   ;;  %s1435_s5 = inlined_call_operand.vmem [shape: f32[32,64], index: 5, kind: input, shape index: {}]   ;;  %s1436_s6 = inlined_call_operand.vmem [shape: f32[32,1], index: 6, kind: input, shape index: {}]   ;;  %s1437_s7 = inlined_call_operand.vmem [shape: f32[32,1], index: 7, kind: input, shape index: {}]   ;;  %s1438_s8 = inlined_call_operand.<no memory space> [shape: f32[1,1], index: 8, kind: input, shape index: {}]   ;;  %s1439_s9 = inlined_call_operand.hbm [shape: f32[1,512], index: 9, kind: output, shape index: {}]  }
   0x1   :  { %v14_v0 = vstv %s1438_s8 }
   0x2   :  { %15 = vst [vmem:[#allocation2] sm:$0x1] %v14_v0 }
   0x3   :  { %v35_v1 = vld [vmem:[%s1430_s0] sm:$0xff]  ;;  %vm82_vm0 = vcmask 1043456   ;;  %v36_v2 = vld [vmem:[%s1430_s0 + $0x8] sm:$0xff]  ;;  %v1177_v5 = vmov 0.0   ;;  %vm69_vm1 = vcmask 31744   ;;  %v1178_v7 = vmov 0  }
   0x4   :  { %v67_v3 = vcombine.high %v35_v1, %v35_v1  ;;  %v68_v4 = vcombine.high %v36_v2, %v36_v2  ;;  %155 = vmatprep.mubr.f32.mxu0 %v1177_v5  ;;  %244 = vmatprep.mubr.f32.mxu1 %v1177_v5  ;;  %v37_v6 = vld [vmem:[%s1431_s1] sm:$0xff]  ;;  %v43_v9 = vld [vmem:[%s1432_s2 + $0x10] sm:$0xff]  ;;  %v38_v10 = vld [vmem:[%s1431_s1 + $0x8] sm:$0xff] }
   0x5   :  { %1149 = vset.pattern.permute.xlu0 %v1178_v7  ;;  %1150 = vset.pattern.permute.xlu1 %v1178_v7  ;;  %v41_v8 = vld [vmem:[%s1432_s2] sm:$0xff]  ;;  %v42_v11 = vld [vmem:[%s1432_s2 + $0x8] sm:$0xff]  ;;  %v44_v12 = vld [vmem:[%s1432_s2 + $0x18] sm:$0xff] }
   0x6   :  { %1061 = vmatprep.subr.msk.mxu0 %vm82_vm0, %v67_v3  ;;  %1067 = vmatprep.subr.msk.mxu1 %vm82_vm0, %v68_v4 }
   0x7   :  { %1062 = vmatpush1.msk.msra.mxu0 %vm82_vm0, %v35_v1  ;;  %1068 = vmatpush1.msk.msra.mxu1 %vm82_vm0, %v36_v2 }
   0x8   :  { %1063 = vmatmul.mubr.msk.f32.vlgmr.msra.gmra.mrb[0].mxu0 %vm69_vm1, %v37_v6  ;;  %1069 = vmatmul.mubr.msk.f32.vlgmr.msra.gmra.mrb[0].mxu1 %vm69_vm1, %v37_v6 }
   0x9   :  { %161 = vmatprep.mubr.f32.mxu0 %v1177_v5  ;;  %250 = vmatprep.mubr.f32.mxu1 %v1177_v5 }
   0xa   :  { %47 = vperm.xlu0 %1149, %v41_v8   ;;  %57 = vperm.xlu1 %1150, %v43_v9  }
   0xc   :  { %1064 = vmatmul.mubr.msk.f32.gmra.mrb[2].mxu0 %vm69_vm1, %v38_v10  ;;  %1070 = vmatmul.mubr.msk.f32.gmra.mrb[2].mxu1 %vm69_vm1, %v38_v10 }
   0xd   :  { %16 = vsyncpa [#allocation4], 0  ;;  %167 = vmatprep.mubr.f32.mxu0 %v1177_v5  ;;  %256 = vmatprep.mubr.f32.mxu1 %v1177_v5  ;;  %v39_v13 = vld [vmem:[%s1431_s1 + $0x10] sm:$0xff]  ;;  %v309_v14 = vld [vmem:[%s1434_s4] sm:$0xff]  ;;  %vm357_vm2 = vcmask 261120   ;;  %vm700_vm3 = vcmask 523264  }
   0xe   :  { %52 = vperm.xlu0 %1149, %v42_v11   ;;  %62 = vperm.xlu1 %1150, %v44_v12   ;;  %v310_v15 = vld [vmem:[%s1434_s4 + $0x8] sm:$0xff]  ;;  %v40_v16 = vld [vmem:[%s1431_s1 + $0x18] sm:$0xff]  ;;  %v311_v17 = vld [vmem:[%s1434_s4 + $0x10] sm:$0xff] }
   0xf   :  { %v312_v18 = vld [vmem:[%s1434_s4 + $0x18] sm:$0xff]  ;;  %v313_v19 = vld [vmem:[%s1434_s4 + $0x20] sm:$0xff]  ;;  %v314_v20 = vld [vmem:[%s1434_s4 + $0x28] sm:$0xff] }
  0x10   :  { %1065 = vmatmul.mubr.msk.f32.gmra.mrb[4].mxu0 %vm69_vm1, %v39_v13  ;;  %1071 = vmatmul.mubr.msk.f32.gmra.mrb[4].mxu1 %vm69_vm1, %v39_v13  ;;  %v315_v21 = vld [vmem:[%s1434_s4 + $0x30] sm:$0xff]  ;;  %v316_v22 = vld [vmem:[%s1434_s4 + $0x38] sm:$0xff]  ;;  %v676_v23 = vld [vmem:[%s1436_s6] sm:$0xff] }
  0x11   :  { %173 = vmatprep.mubr.f32.mxu0 %v1177_v5  ;;  %262 = vmatprep.mubr.f32.mxu1 %v1177_v5  ;;  %v677_v24 = vld [vmem:[%s1436_s6 + $0x8] sm:$0xff]  ;;  %v678_v25 = vld [vmem:[%s1436_s6 + $0x10] sm:$0xff]  ;;  %v679_v26 = vld [vmem:[%s1436_s6 + $0x18] sm:$0xff] }
  0x12   :  { %319 = vperm.xlu0 %1149, %v309_v14   ;;  %324 = vperm.xlu1 %1150, %v310_v15   ;;  %v923_v27 = vld [vmem:[%s1437_s7] sm:$0xff]  ;;  %v924_v28 = vld [vmem:[%s1437_s7 + $0x8] sm:$0xff]  ;;  %v925_v29 = vld [vmem:[%s1437_s7 + $0x10] sm:$0xff] }
  0x13   :  { %v926_v30 = vld [vmem:[%s1437_s7 + $0x18] sm:$0xff]  ;;  %v999_v31 = vld [vmem:[#allocation2] sm:$0x1] }
  0x14   :  { %1066 = vmatmul.mubr.msk.f32.gmra.mrb[6].mxu0 %vm69_vm1, %v40_v16  ;;  %1072 = vmatmul.mubr.msk.f32.gmra.mrb[6].mxu1 %vm69_vm1, %v40_v16 }
  0x15   :  { %446 = vmatprep.mubr.f32.mxu0 %v1177_v5  ;;  %559 = vmatprep.mubr.f32.mxu1 %v1177_v5 }
  0x16   :  { %329 = vperm.xlu0 %1149, %v311_v17   ;;  %334 = vperm.xlu1 %1150, %v312_v18  }
  0x1a   :  { %339 = vperm.xlu0 %1149, %v313_v19   ;;  %344 = vperm.xlu1 %1150, %v314_v20  }
  0x1e   :  { %349 = vperm.xlu0 %1149, %v315_v21   ;;  %354 = vperm.xlu1 %1150, %v316_v22  }
  0x22   :  { %682 = vperm.xlu0 %1149, %v676_v23   ;;  %687 = vperm.xlu1 %1150, %v677_v24  }
  0x26   :  { %692 = vperm.xlu0 %1149, %v678_v25   ;;  %697 = vperm.xlu1 %1150, %v679_v26  }
  0x2a   :  { %929 = vperm.xlu0 %1149, %v923_v27   ;;  %934 = vperm.xlu1 %1150, %v924_v28  }
  0x2e   :  { %939 = vperm.xlu0 %1149, %v925_v29   ;;  %944 = vperm.xlu1 %1150, %v926_v30  }
  0x32   :  { %1002 = vperm.xlu0 %1149, %v999_v31  }
  0x89   :  { %v48_v32 = vpop.permute.xlu0 %47  ;;  %v58_v42 = vpop.permute.xlu1 %57 }
  0x8d   :  { %v53_v41 = vpop.permute.xlu0 %52  ;;  %v63_v12 = vpop.permute.xlu1 %62 }
  0xdb   :  { %v157_v33 = vpop.f32.mrb[0].mxu0  ;;  %v246_v34 = vpop.f32.mrb[0].mxu1 }
  0xdc   :  { %v158_v35 = vadd.f32 %v157_v33, %v48_v32  ;;  %v247_v36 = vadd.f32 %v246_v34, %v48_v32  ;;  %v159_v37 = vpop.f32.mrb[1].mxu0  ;;  %v248_v38 = vpop.f32.mrb[1].mxu1 }
  0xdd   :  { %v160_v39 = vadd.f32 %v159_v37, %v48_v32  ;;  %v249_v40 = vadd.f32 %v248_v38, %v48_v32 }
  0xde   :  { %v269_v43 = vmul.f32 0.01, %v158_v35  ;;  %v271_v44 = vmul.f32 0.01, %v247_v36 }
  0xdf   :  { %v270_v45 = vmul.f32 0.01, %v160_v39  ;;  %v272_v46 = vmul.f32 0.01, %v249_v40  ;;  %v163_v47 = vpop.f32.mrb[2].mxu0  ;;  %v252_v48 = vpop.f32.mrb[2].mxu1 }
  0xe0   :  { %v164_v49 = vadd.f32 %v163_v47, %v53_v41  ;;  %v253_v50 = vadd.f32 %v252_v48, %v53_v41  ;;  %v165_v51 = vpop.f32.mrb[3].mxu0  ;;  %v254_v52 = vpop.f32.mrb[3].mxu1  ;;  %v285_v55 = vmax.f32 %v158_v35, %v269_v43  ;;  %v287_v56 = vmax.f32 %v247_v36, %v271_v44  ;;  %v303_v47 = vld [vmem:[%s1433_s3 + $0x10] sm:$0xff]  ;;  %v304_v48 = vld [vmem:[%s1433_s3 + $0x18] sm:$0xff] }
  0xe1   :  { %v166_v53 = vadd.f32 %v165_v51, %v53_v41  ;;  %v255_v54 = vadd.f32 %v254_v52, %v53_v41  ;;  %v286_v59 = vmax.f32 %v160_v39, %v270_v45  ;;  %v288_v60 = vmax.f32 %v249_v40, %v272_v46  ;;  %v301_v45 = vld [vmem:[%s1433_s3] sm:$0xff]  ;;  %v302_v46 = vld [vmem:[%s1433_s3 + $0x8] sm:$0xff]  ;;  %v307_v51 = vld [vmem:[%s1433_s3 + $0x30] sm:$0xff] }
  0xe2   :  { %v273_v57 = vmul.f32 0.01, %v164_v49  ;;  %v275_v58 = vmul.f32 0.01, %v253_v50  ;;  %v308_v52 = vld [vmem:[%s1433_s3 + $0x38] sm:$0xff] }
  0xe3   :  { %v274_v61 = vmul.f32 0.01, %v166_v53  ;;  %v276_v62 = vmul.f32 0.01, %v255_v54  ;;  %v169_v63 = vpop.f32.mrb[4].mxu0  ;;  %v258_v0 = vpop.f32.mrb[4].mxu1 }
  0xe4   :  { %v289_v1 = vmax.f32 %v164_v49, %v273_v57  ;;  %v291_v2 = vmax.f32 %v253_v50, %v275_v58  ;;  %v170_v3 = vadd.f32 %v169_v63, %v58_v42  ;;  %v259_v4 = vadd.f32 %v258_v0, %v58_v42  ;;  %v171_v6 = vpop.f32.mrb[5].mxu0  ;;  %v260_v7 = vpop.f32.mrb[5].mxu1  ;;  %v305_v49 = vld [vmem:[%s1433_s3 + $0x20] sm:$0xff]  ;;  %v306_v50 = vld [vmem:[%s1433_s3 + $0x28] sm:$0xff] }
  0xe5   :  { %v290_v8 = vmax.f32 %v166_v53, %v274_v61  ;;  %v292_v9 = vmax.f32 %v255_v54, %v276_v62  ;;  %v172_v10 = vadd.f32 %v171_v6, %v58_v42  ;;  %v261_v11 = vadd.f32 %v260_v7, %v58_v42  ;;  %v320_v53 = vpop.permute.xlu0 %319  ;;  %v325_v62 = vpop.permute.xlu1 %324 }
  0xe6   :  { %v1099_v13 = vpack.c.bf16 %v289_v1, %v285_v55  ;;  %v1107_v14 = vpack.c.bf16 %v291_v2, %v287_v56  ;;  %v277_v19 = vmul.f32 0.01, %v170_v3  ;;  %v279_v20 = vmul.f32 0.01, %v259_v4 }
  0xe7   :  { %v175_v15 = vpop.f32.mrb[6].mxu0  ;;  %v264_v16 = vpop.f32.mrb[6].mxu1  ;;  %v1097_v17 = vpack.c.bf16 %v290_v8, %v286_v59  ;;  %v1105_v18 = vpack.c.bf16 %v292_v9, %v288_v60  ;;  %v278_v25 = vmul.f32 0.01, %v172_v10  ;;  %v280_v26 = vmul.f32 0.01, %v261_v11 }
  0xe8   :  { %v176_v21 = vadd.f32 %v175_v15, %v63_v12  ;;  %v265_v22 = vadd.f32 %v264_v16, %v63_v12  ;;  %v177_v23 = vpop.f32.mrb[7].mxu0  ;;  %v266_v24 = vpop.f32.mrb[7].mxu1  ;;  %v293_v33 = vmax.f32 %v170_v3, %v277_v19  ;;  %v295_v34 = vmax.f32 %v259_v4, %v279_v20 }
  0xe9   :  { %v178_v27 = vadd.f32 %v177_v23, %v63_v12  ;;  %v267_v28 = vadd.f32 %v266_v24, %v63_v12  ;;  %1098 = vmatprep.subr.bf16.mxu0 %v1097_v17  ;;  %1106 = vmatprep.subr.bf16.mxu1 %v1105_v18  ;;  %v294_v37 = vmax.f32 %v172_v10, %v278_v25  ;;  %v330_v12 = vpop.permute.xlu0 %329 }
  0xea   :  { %v281_v29 = vmul.f32 0.01, %v176_v21  ;;  %v283_v30 = vmul.f32 0.01, %v265_v22  ;;  %1100 = vmatpush1.bf16.msra.mxu0 %v1099_v13  ;;  %1108 = vmatpush1.bf16.msra.mxu1 %v1107_v14  ;;  %v296_v38 = vmax.f32 %v261_v11, %v280_v26 }
  0xeb   :  { %v282_v31 = vmul.f32 0.01, %v178_v27  ;;  %v284_v32 = vmul.f32 0.01, %v267_v28 }
  0xec   :  { %v297_v35 = vmax.f32 %v176_v21, %v281_v29  ;;  %v299_v36 = vmax.f32 %v265_v22, %v283_v30 }
  0xed   :  { %v298_v39 = vmax.f32 %v178_v27, %v282_v31  ;;  %v300_v40 = vmax.f32 %v267_v28, %v284_v32 }
  0xee   :  { %v1103_v41 = vpack.c.bf16 %v297_v35, %v293_v33  ;;  %v1111_v42 = vpack.c.bf16 %v299_v36, %v295_v34  ;;  %v335_v33 = vpop.permute.xlu1 %334 }
  0xef   :  { %v1101_v43 = vpack.c.bf16 %v298_v39, %v294_v37  ;;  %v1109_v44 = vpack.c.bf16 %v300_v40, %v296_v38 }
  0xf1   :  { %1102 = vmatprep.subr.bf16.mxu0 %v1101_v43  ;;  %1110 = vmatprep.subr.bf16.mxu1 %v1109_v44 }
  0xf2   :  { %1104 = vmatpush1.bf16.msra.mxu0 %v1103_v41  ;;  %1112 = vmatpush1.bf16.msra.mxu1 %v1111_v42 }
  0xf5   :  { %1073 = vmatmul.mubr.msk.f32.vlgmr.msra.gmra.mrb[8].mxu0 %vm357_vm2, %v301_v45  ;;  %1081 = vmatmul.mubr.msk.f32.vlgmr.msra.gmra.mrb[8].mxu1 %vm357_vm2, %v301_v45 }
  0xf6   :  { %452 = vmatprep.mubr.f32.mxu0 %v1177_v5  ;;  %565 = vmatprep.mubr.f32.mxu1 %v1177_v5 }
  0xf9   :  { %1074 = vmatmul.mubr.msk.f32.gmra.mrb[10].mxu0 %vm357_vm2, %v302_v46  ;;  %1082 = vmatmul.mubr.msk.f32.gmra.mrb[10].mxu1 %vm357_vm2, %v302_v46 }
  0xfa   :  { %458 = vmatprep.mubr.f32.mxu0 %v1177_v5  ;;  %571 = vmatprep.mubr.f32.mxu1 %v1177_v5 }
  0xfd   :  { %1075 = vmatmul.mubr.msk.f32.gmra.mrb[12].mxu0 %vm357_vm2, %v303_v47  ;;  %1083 = vmatmul.mubr.msk.f32.gmra.mrb[12].mxu1 %vm357_vm2, %v303_v47 }
  0xfe   :  { %464 = vmatprep.mubr.f32.mxu0 %v1177_v5  ;;  %577 = vmatprep.mubr.f32.mxu1 %v1177_v5 }
 0x101   :  { %1076 = vmatmul.mubr.msk.f32.gmra.mrb[14].mxu0 %vm357_vm2, %v304_v48  ;;  %1084 = vmatmul.mubr.msk.f32.gmra.mrb[14].mxu1 %vm357_vm2, %v304_v48 }
 0x102   :  { %470 = vmatprep.mubr.f32.mxu0 %v1177_v5  ;;  %583 = vmatprep.mubr.f32.mxu1 %v1177_v5 }
 0x105   :  { %1077 = vmatmul.mubr.msk.f32.gmra.mrb[16].mxu0 %vm357_vm2, %v305_v49  ;;  %1085 = vmatmul.mubr.msk.f32.gmra.mrb[16].mxu1 %vm357_vm2, %v305_v49 }
 0x106   :  { %476 = vmatprep.mubr.f32.mxu0 %v1177_v5  ;;  %589 = vmatprep.mubr.f32.mxu1 %v1177_v5 }
 0x109   :  { %1078 = vmatmul.mubr.msk.f32.gmra.mrb[18].mxu0 %vm357_vm2, %v306_v50  ;;  %1086 = vmatmul.mubr.msk.f32.gmra.mrb[18].mxu1 %vm357_vm2, %v306_v50  ;;  %v340_v50 = vpop.permute.xlu0 %339 }
 0x10a   :  { %482 = vmatprep.mubr.f32.mxu0 %v1177_v5  ;;  %595 = vmatprep.mubr.f32.mxu1 %v1177_v5 }
 0x10d   :  { %1079 = vmatmul.mubr.msk.f32.gmra.mrb[20].mxu0 %vm357_vm2, %v307_v51  ;;  %1087 = vmatmul.mubr.msk.f32.gmra.mrb[20].mxu1 %vm357_vm2, %v307_v51 }
 0x10e   :  { %488 = vmatprep.mubr.f32.mxu0 %v1177_v5  ;;  %601 = vmatprep.mubr.f32.mxu1 %v1177_v5 }
 0x111   :  { %1080 = vmatmul.mubr.msk.f32.gmra.mrb[22].mxu0 %vm357_vm2, %v308_v52  ;;  %1088 = vmatmul.mubr.msk.f32.gmra.mrb[22].mxu1 %vm357_vm2, %v308_v52 }
 0x112   :  { %777 = vmatprep.mubr.f32.mxu0 %v1177_v5  ;;  %866 = vmatprep.mubr.f32.mxu1 %v1177_v5 }
 0x1c8   :  { %v448_v54 = vpop.f32.mrb[8].mxu0  ;;  %v561_v55 = vpop.f32.mrb[8].mxu1 }
 0x1c9   :  { %v449_v56 = vadd.f32 %v448_v54, %v320_v53  ;;  %v562_v57 = vadd.f32 %v561_v55, %v320_v53  ;;  %v450_v58 = vpop.f32.mrb[9].mxu0  ;;  %v563_v59 = vpop.f32.mrb[9].mxu1 }
 0x1ca   :  { %v451_v60 = vadd.f32 %v450_v58, %v320_v53  ;;  %v564_v61 = vadd.f32 %v563_v59, %v320_v53 }
 0x1cb   :  { %v608_v63 = vmul.f32 0.01, %v449_v56  ;;  %v610_v0 = vmul.f32 0.01, %v562_v57 }
 0x1cc   :  { %v609_v1 = vmul.f32 0.01, %v451_v60  ;;  %v611_v2 = vmul.f32 0.01, %v564_v61  ;;  %v454_v3 = vpop.f32.mrb[10].mxu0  ;;  %v567_v4 = vpop.f32.mrb[10].mxu1 }
 0x1cd   :  { %v455_v6 = vadd.f32 %v454_v3, %v325_v62  ;;  %v568_v7 = vadd.f32 %v567_v4, %v325_v62  ;;  %v456_v8 = vpop.f32.mrb[11].mxu0  ;;  %v569_v9 = vpop.f32.mrb[11].mxu1  ;;  %v640_v13 = vmax.f32 %v449_v56, %v608_v63  ;;  %v642_v14 = vmax.f32 %v562_v57, %v610_v0 }
 0x1ce   :  { %v457_v10 = vadd.f32 %v456_v8, %v325_v62  ;;  %v570_v11 = vadd.f32 %v569_v9, %v325_v62  ;;  %v641_v17 = vmax.f32 %v451_v60, %v609_v1  ;;  %v643_v18 = vmax.f32 %v564_v61, %v611_v2  ;;  %v345_v8 = vpop.permute.xlu1 %344 }
 0x1cf   :  { %v612_v15 = vmul.f32 0.01, %v455_v6  ;;  %v614_v16 = vmul.f32 0.01, %v568_v7 }
 0x1d0   :  { %v613_v19 = vmul.f32 0.01, %v457_v10  ;;  %v615_v20 = vmul.f32 0.01, %v570_v11  ;;  %v460_v21 = vpop.f32.mrb[12].mxu0  ;;  %v573_v22 = vpop.f32.mrb[12].mxu1 }
 0x1d1   :  { %v644_v23 = vmax.f32 %v455_v6, %v612_v15  ;;  %v646_v24 = vmax.f32 %v568_v7, %v614_v16  ;;  %v461_v25 = vadd.f32 %v460_v21, %v330_v12  ;;  %v574_v26 = vadd.f32 %v573_v22, %v330_v12  ;;  %v462_v27 = vpop.f32.mrb[13].mxu0  ;;  %v575_v28 = vpop.f32.mrb[13].mxu1 }
 0x1d2   :  { %v645_v29 = vmax.f32 %v457_v10, %v613_v19  ;;  %v647_v30 = vmax.f32 %v570_v11, %v615_v20  ;;  %v463_v31 = vadd.f32 %v462_v27, %v330_v12  ;;  %v576_v32 = vadd.f32 %v575_v28, %v330_v12 }
 0x1d3   :  { %v1115_v34 = vpack.c.bf16 %v644_v23, %v640_v13  ;;  %v1131_v35 = vpack.c.bf16 %v646_v24, %v642_v14  ;;  %v616_v36 = vmul.f32 0.01, %v461_v25  ;;  %v618_v37 = vmul.f32 0.01, %v574_v26 }
 0x1d4   :  { %v617_v38 = vmul.f32 0.01, %v463_v31  ;;  %v619_v39 = vmul.f32 0.01, %v576_v32  ;;  %v466_v40 = vpop.f32.mrb[14].mxu0  ;;  %v579_v41 = vpop.f32.mrb[14].mxu1  ;;  %v1113_v42 = vpack.c.bf16 %v645_v29, %v641_v17  ;;  %v1129_v43 = vpack.c.bf16 %v647_v30, %v643_v18 }
 0x1d5   :  { %v467_v44 = vadd.f32 %v466_v40, %v335_v33  ;;  %v580_v45 = vadd.f32 %v579_v41, %v335_v33  ;;  %v468_v46 = vpop.f32.mrb[15].mxu0  ;;  %v581_v47 = vpop.f32.mrb[15].mxu1  ;;  %v648_v51 = vmax.f32 %v461_v25, %v616_v36  ;;  %v650_v52 = vmax.f32 %v574_v26, %v618_v37 }
 0x1d6   :  { %v469_v48 = vadd.f32 %v468_v46, %v335_v33  ;;  %v582_v49 = vadd.f32 %v581_v47, %v335_v33  ;;  %1114 = vmatprep.subr.bf16.mxu0 %v1113_v42  ;;  %1130 = vmatprep.subr.bf16.mxu1 %v1129_v43  ;;  %v649_v55 = vmax.f32 %v463_v31, %v617_v38  ;;  %v350_v25 = vpop.permute.xlu0 %349  ;;  %v355_v46 = vpop.permute.xlu1 %354 }
 0x1d7   :  { %v620_v53 = vmul.f32 0.01, %v467_v44  ;;  %v622_v54 = vmul.f32 0.01, %v580_v45  ;;  %1116 = vmatpush1.bf16.msra.mxu0 %v1115_v34  ;;  %v651_v56 = vmax.f32 %v576_v32, %v619_v39  ;;  %1132 = vmatpush1.bf16.msra.mxu1 %v1131_v35 }
 0x1d8   :  { %v621_v57 = vmul.f32 0.01, %v469_v48  ;;  %v623_v58 = vmul.f32 0.01, %v582_v49  ;;  %v472_v59 = vpop.f32.mrb[16].mxu0  ;;  %v585_v60 = vpop.f32.mrb[16].mxu1 }
 0x1d9   :  { %v652_v61 = vmax.f32 %v467_v44, %v620_v53  ;;  %v654_v62 = vmax.f32 %v580_v45, %v622_v54  ;;  %v473_v63 = vadd.f32 %v472_v59, %v340_v50  ;;  %v586_v0 = vadd.f32 %v585_v60, %v340_v50  ;;  %v474_v1 = vpop.f32.mrb[17].mxu0  ;;  %v587_v2 = vpop.f32.mrb[17].mxu1 }
 0x1da   :  { %v653_v3 = vmax.f32 %v469_v48, %v621_v57  ;;  %v655_v4 = vmax.f32 %v582_v49, %v623_v58  ;;  %v475_v6 = vadd.f32 %v474_v1, %v340_v50  ;;  %v588_v7 = vadd.f32 %v587_v2, %v340_v50 }
 0x1db   :  { %v1119_v9 = vpack.c.bf16 %v652_v61, %v648_v51  ;;  %v1135_v10 = vpack.c.bf16 %v654_v62, %v650_v52  ;;  %v624_v11 = vmul.f32 0.01, %v473_v63  ;;  %v626_v12 = vmul.f32 0.01, %v586_v0 }
 0x1dc   :  { %v625_v13 = vmul.f32 0.01, %v475_v6  ;;  %v627_v14 = vmul.f32 0.01, %v588_v7  ;;  %v478_v15 = vpop.f32.mrb[18].mxu0  ;;  %v591_v16 = vpop.f32.mrb[18].mxu1  ;;  %v1117_v17 = vpack.c.bf16 %v653_v3, %v649_v55  ;;  %v1133_v18 = vpack.c.bf16 %v655_v4, %v651_v56 }
 0x1dd   :  { %v479_v19 = vadd.f32 %v478_v15, %v345_v8  ;;  %v592_v20 = vadd.f32 %v591_v16, %v345_v8  ;;  %v480_v21 = vpop.f32.mrb[19].mxu0  ;;  %v593_v22 = vpop.f32.mrb[19].mxu1  ;;  %v656_v26 = vmax.f32 %v473_v63, %v624_v11  ;;  %v658_v27 = vmax.f32 %v586_v0, %v626_v12  ;;  %v672_v16 = vld [vmem:[%s1435_s5] sm:$0xff] }
 0x1de   :  { %v481_v23 = vadd.f32 %v480_v21, %v345_v8  ;;  %v594_v24 = vadd.f32 %v593_v22, %v345_v8  ;;  %1118 = vmatprep.subr.bf16.mxu0 %v1117_v17  ;;  %1134 = vmatprep.subr.bf16.mxu1 %v1133_v18  ;;  %v657_v30 = vmax.f32 %v475_v6, %v625_v13  ;;  %v673_v17 = vld [vmem:[%s1435_s5 + $0x8] sm:$0xff]  ;;  %v674_v18 = vld [vmem:[%s1435_s5 + $0x10] sm:$0xff]  ;;  %v688_v21 = vpop.permute.xlu1 %687 }
 0x1df   :  { %v628_v28 = vmul.f32 0.01, %v479_v19  ;;  %v630_v29 = vmul.f32 0.01, %v592_v20  ;;  %1120 = vmatpush1.bf16.msra.mxu0 %v1119_v9  ;;  %v659_v31 = vmax.f32 %v588_v7, %v627_v14  ;;  %1136 = vmatpush1.bf16.msra.mxu1 %v1135_v10 }
 0x1e0   :  { %v629_v32 = vmul.f32 0.01, %v481_v23  ;;  %v631_v33 = vmul.f32 0.01, %v594_v24  ;;  %v484_v34 = vpop.f32.mrb[20].mxu0  ;;  %v597_v35 = vpop.f32.mrb[20].mxu1 }
 0x1e1   :  { %v660_v36 = vmax.f32 %v479_v19, %v628_v28  ;;  %v662_v37 = vmax.f32 %v592_v20, %v630_v29  ;;  %v485_v38 = vadd.f32 %v484_v34, %v350_v25  ;;  %v598_v39 = vadd.f32 %v597_v35, %v350_v25  ;;  %v486_v40 = vpop.f32.mrb[21].mxu0  ;;  %v599_v41 = vpop.f32.mrb[21].mxu1  ;;  %v675_v19 = vld [vmem:[%s1435_s5 + $0x18] sm:$0xff]  ;;  %s1180_s5 = smov [#allocation3]  }
 0x1e2   :  { %v661_v42 = vmax.f32 %v481_v23, %v629_v32  ;;  %v663_v43 = vmax.f32 %v594_v24, %v631_v33  ;;  %v487_v44 = vadd.f32 %v486_v40, %v350_v25  ;;  %v600_v45 = vadd.f32 %v599_v41, %v350_v25  ;;  %v683_v20 = vpop.permute.xlu0 %682  ;;  %s1053_s29 = sshll.u32 %s1180_s5, 4  ;;  %s1054_s29 = int_to_ptr.vmem [resolvable:$true] %s1053_s29 }
 0x1e3   :  { %v1123_v47 = vpack.c.bf16 %v660_v36, %v656_v26  ;;  %v1139_v48 = vpack.c.bf16 %v662_v37, %v658_v27  ;;  %v632_v53 = vmul.f32 0.01, %v485_v38  ;;  %v634_v54 = vmul.f32 0.01, %v598_v39  ;;  %s1153_s30 = scalar_lea.vmem %s1054_s29, 64  ;;  %p1158_p1 = scmp.lt.s32.totalorder %s1054_s29, %s1054_s29 }
 0x1e4   :  { %v490_v49 = vpop.f32.mrb[22].mxu0  ;;  %v603_v50 = vpop.f32.mrb[22].mxu1  ;;  %v1121_v51 = vpack.c.bf16 %v661_v42, %v657_v30  ;;  %v1137_v52 = vpack.c.bf16 %v663_v43, %v659_v31  ;;  %v633_v59 = vmul.f32 0.01, %v487_v44  ;;  %v635_v60 = vmul.f32 0.01, %v600_v45  ;;  %p1154_p0 = scmp.ne.s32.totalorder %s1054_s29, %s1153_s30  ;;  %p1159_p2 = scmp.lt.s32.totalorder %s1153_s30, %s1153_s30 }
 0x1e5   :  { %v491_v55 = vadd.f32 %v490_v49, %v355_v46  ;;  %v604_v56 = vadd.f32 %v603_v50, %v355_v46  ;;  %v492_v57 = vpop.f32.mrb[23].mxu0  ;;  %v605_v58 = vpop.f32.mrb[23].mxu1  ;;  %v664_v3 = vmax.f32 %v485_v38, %v632_v53  ;;  %v666_v4 = vmax.f32 %v598_v39, %v634_v54 }
 0x1e6   :  { %v493_v61 = vadd.f32 %v492_v57, %v355_v46  ;;  %v606_v62 = vadd.f32 %v605_v58, %v355_v46  ;;  %1122 = vmatprep.subr.bf16.mxu0 %v1121_v51  ;;  %1138 = vmatprep.subr.bf16.mxu1 %v1137_v52  ;;  %v665_v8 = vmax.f32 %v487_v44, %v633_v59  ;;  %v693_v22 = vpop.permute.xlu0 %692  ;;  %p1160_p3 = por %p1159_p2, %p1158_p1 }
 0x1e7   :  { %v636_v63 = vmul.f32 0.01, %v491_v55  ;;  %v638_v0 = vmul.f32 0.01, %v604_v56  ;;  %1124 = vmatpush1.bf16.msra.mxu0 %v1123_v47  ;;  %1140 = vmatpush1.bf16.msra.mxu1 %v1139_v48  ;;  %v667_v9 = vmax.f32 %v600_v45, %v635_v60 }
 0x1e8   :  { %v637_v1 = vmul.f32 0.01, %v493_v61  ;;  %v639_v2 = vmul.f32 0.01, %v606_v62  ;;  %p1161_p4 = pnand %p1160_p3, %p1154_p0 }
 0x1e9   :  { %v668_v6 = vmax.f32 %v491_v55, %v636_v63  ;;  %v670_v7 = vmax.f32 %v604_v56, %v638_v0 }
 0x1ea   :  { %v669_v10 = vmax.f32 %v493_v61, %v637_v1  ;;  %v671_v11 = vmax.f32 %v606_v62, %v639_v2  ;;  %v930_v43 = vpop.permute.xlu0 %929 }
 0x1eb   :  { %v1127_v12 = vpack.c.bf16 %v668_v6, %v664_v3  ;;  %v1143_v13 = vpack.c.bf16 %v670_v7, %v666_v4 }
 0x1ec   :  { %v1125_v14 = vpack.c.bf16 %v669_v10, %v665_v8  ;;  %v1141_v15 = vpack.c.bf16 %v671_v11, %v667_v9 }
 0x1ee   :  { %1126 = vmatprep.subr.bf16.mxu0 %v1125_v14  ;;  %1142 = vmatprep.subr.bf16.mxu1 %v1141_v15 }
 0x1ef   :  { %1128 = vmatpush1.bf16.msra.mxu0 %v1127_v12  ;;  %1144 = vmatpush1.bf16.msra.mxu1 %v1143_v13 }
 0x1f2   :  { %1089 = vmatmul.mubr.msk.f32.vlgmr.msra.gmra.mrb[24].mxu0 %vm700_vm3, %v672_v16  ;;  %1093 = vmatmul.mubr.msk.f32.vlgmr.msra.gmra.mrb[24].mxu1 %vm700_vm3, %v672_v16 }
 0x1f3   :  { %783 = vmatprep.mubr.f32.mxu0 %v1177_v5  ;;  %872 = vmatprep.mubr.f32.mxu1 %v1177_v5 }
 0x1f6   :  { %1090 = vmatmul.mubr.msk.f32.gmra.mrb[26].mxu0 %vm700_vm3, %v673_v17  ;;  %1094 = vmatmul.mubr.msk.f32.gmra.mrb[26].mxu1 %vm700_vm3, %v673_v17 }
 0x1f7   :  { %789 = vmatprep.mubr.f32.mxu0 %v1177_v5  ;;  %878 = vmatprep.mubr.f32.mxu1 %v1177_v5 }
 0x1fa   :  { %1091 = vmatmul.mubr.msk.f32.gmra.mrb[28].mxu0 %vm700_vm3, %v674_v18  ;;  %1095 = vmatmul.mubr.msk.f32.gmra.mrb[28].mxu1 %vm700_vm3, %v674_v18 }
 0x1fb   :  { %795 = vmatprep.mubr.f32.mxu0 %v1177_v5  ;;  %884 = vmatprep.mubr.f32.mxu1 %v1177_v5  ;;  %v1412_v5 = vpop.permute.xlu1 %697 }
 0x1fe   :  { %1092 = vmatmul.mubr.msk.f32.gmra.mrb[30].mxu0 %vm700_vm3, %v675_v19  ;;  %1096 = vmatmul.mubr.msk.f32.gmra.mrb[30].mxu1 %vm700_vm3, %v675_v19 }
 0x1ff   :  { %v935_v0 = vpop.permute.xlu1 %934 }
 0x2c5   :  { %v779_v23 = vpop.f32.mrb[24].mxu0  ;;  %v868_v24 = vpop.f32.mrb[24].mxu1 }
 0x2c6   :  { %v780_v25 = vadd.f32 %v779_v23, %v683_v20  ;;  %v869_v26 = vadd.f32 %v868_v24, %v683_v20  ;;  %v781_v27 = vpop.f32.mrb[25].mxu0  ;;  %v870_v28 = vpop.f32.mrb[25].mxu1 }
 0x2c7   :  { %v782_v29 = vadd.f32 %v781_v27, %v683_v20  ;;  %v871_v30 = vadd.f32 %v870_v28, %v683_v20  ;;  %v940_v23 = vpop.permute.xlu0 %939 }
 0x2c8   :  { %v891_v31 = vmul.f32 0.01, %v780_v25  ;;  %v893_v32 = vmul.f32 0.01, %v869_v26 }
 0x2c9   :  { %v892_v33 = vmul.f32 0.01, %v782_v29  ;;  %v894_v34 = vmul.f32 0.01, %v871_v30  ;;  %v785_v35 = vpop.f32.mrb[26].mxu0  ;;  %v874_v36 = vpop.f32.mrb[26].mxu1 }
 0x2ca   :  { %v907_v37 = vmax.f32 %v780_v25, %v891_v31  ;;  %v909_v38 = vmax.f32 %v869_v26, %v893_v32  ;;  %v786_v39 = vadd.f32 %v785_v35, %v688_v21  ;;  %v875_v40 = vadd.f32 %v874_v36, %v688_v21  ;;  %v787_v41 = vpop.f32.mrb[27].mxu0  ;;  %v876_v42 = vpop.f32.mrb[27].mxu1 }
 0x2cb   :  { %v908_v44 = vmax.f32 %v782_v29, %v892_v33  ;;  %v910_v45 = vmax.f32 %v871_v30, %v894_v34  ;;  %v788_v46 = vadd.f32 %v787_v41, %v688_v21  ;;  %v877_v47 = vadd.f32 %v876_v42, %v688_v21 }
 0x2cc   :  { %v947_v48 = vmul.f32 %v930_v43, %v907_v37  ;;  %v949_v49 = vmul.f32 %v930_v43, %v909_v38  ;;  %v895_v50 = vmul.f32 0.01, %v786_v39  ;;  %v897_v51 = vmul.f32 0.01, %v875_v40 }
 0x2cd   :  { %v948_v52 = vmul.f32 %v930_v43, %v908_v44  ;;  %v950_v53 = vmul.f32 %v930_v43, %v910_v45  ;;  %v896_v54 = vmul.f32 0.01, %v788_v46  ;;  %v898_v55 = vmul.f32 0.01, %v877_v47  ;;  %v791_v56 = vpop.f32.mrb[28].mxu0  ;;  %v880_v57 = vpop.f32.mrb[28].mxu1 }
 0x2ce   :  { %v911_v58 = vmax.f32 %v786_v39, %v895_v50  ;;  %v913_v59 = vmax.f32 %v875_v40, %v897_v51  ;;  %v792_v60 = vadd.f32 %v791_v56, %v693_v22  ;;  %v881_v61 = vadd.f32 %v880_v57, %v693_v22  ;;  %v793_v62 = vpop.f32.mrb[29].mxu0  ;;  %v882_v63 = vpop.f32.mrb[29].mxu1 }
 0x2cf   :  { %v912_v1 = vmax.f32 %v788_v46, %v896_v54  ;;  %v914_v2 = vmax.f32 %v877_v47, %v898_v55  ;;  %v794_v3 = vadd.f32 %v793_v62, %v693_v22  ;;  %v883_v4 = vadd.f32 %v882_v63, %v693_v22  ;;  %v945_v45 = vpop.permute.xlu1 %944 }
 0x2d0   :  { %v951_v6 = vmul.f32 %v935_v0, %v911_v58  ;;  %v953_v7 = vmul.f32 %v935_v0, %v913_v59  ;;  %v899_v8 = vmul.f32 0.01, %v792_v60  ;;  %v901_v9 = vmul.f32 0.01, %v881_v61 }
 0x2d1   :  { %v952_v10 = vmul.f32 %v935_v0, %v912_v1  ;;  %v954_v11 = vmul.f32 %v935_v0, %v914_v2  ;;  %v900_v12 = vmul.f32 0.01, %v794_v3  ;;  %v902_v13 = vmul.f32 0.01, %v883_v4  ;;  %v797_v14 = vpop.f32.mrb[30].mxu0  ;;  %v886_v15 = vpop.f32.mrb[30].mxu1 }
 0x2d2   :  { %v963_v16 = vadd.f32 %v951_v6, %v947_v48  ;;  %v981_v17 = vadd.f32 %v953_v7, %v949_v49  ;;  %v915_v18 = vmax.f32 %v792_v60, %v899_v8  ;;  %v917_v19 = vmax.f32 %v881_v61, %v901_v9  ;;  %v799_v20 = vpop.f32.mrb[31].mxu0  ;;  %v888_v21 = vpop.f32.mrb[31].mxu1 }
 0x2d3   :  { %v972_v24 = vadd.f32 %v952_v10, %v948_v52  ;;  %v990_v25 = vadd.f32 %v954_v11, %v950_v53  ;;  %v916_v22 = vmax.f32 %v794_v3, %v900_v12  ;;  %v918_v26 = vmax.f32 %v883_v4, %v902_v13  ;;  %v1003_v11 = vpop.permute.xlu0 %1002 }
 0x2d4   :  { %v955_v27 = vmul.f32 %v940_v23, %v915_v18  ;;  %v957_v28 = vmul.f32 %v940_v23, %v917_v19  ;;  %v798_v29 = vadd.f32 %v797_v14, %v1412_v5  ;;  %v887_v30 = vadd.f32 %v886_v15, %v1412_v5 }
 0x2d5   :  { %v956_v31 = vmul.f32 %v940_v23, %v916_v22  ;;  %v958_v32 = vmul.f32 %v940_v23, %v918_v26  ;;  %v800_v33 = vadd.f32 %v799_v20, %v1412_v5  ;;  %v889_v34 = vadd.f32 %v888_v21, %v1412_v5 }
 0x2d6   :  { %v964_v35 = vadd.f32 %v963_v16, %v955_v27  ;;  %v982_v36 = vadd.f32 %v981_v17, %v957_v28  ;;  %v903_v37 = vmul.f32 0.01, %v798_v29  ;;  %v905_v38 = vmul.f32 0.01, %v887_v30 }
 0x2d7   :  { %v973_v39 = vadd.f32 %v972_v24, %v956_v31  ;;  %v991_v40 = vadd.f32 %v990_v25, %v958_v32  ;;  %v904_v41 = vmul.f32 0.01, %v800_v33  ;;  %v906_v42 = vmul.f32 0.01, %v889_v34 }
 0x2d8   :  { %v919_v43 = vmax.f32 %v798_v29, %v903_v37  ;;  %v921_v44 = vmax.f32 %v887_v30, %v905_v38  ;;  %v1005_v52 = vlaneseq  ;;  %v1179_v3 = vmov 1966171168  }
 0x2d9   :  { %v920_v46 = vmax.f32 %v800_v33, %v904_v41  ;;  %v922_v47 = vmax.f32 %v889_v34, %v906_v42  ;;  %v1020_v4 = vunpack.c.l.s4 %v1179_v3 }
 0x2da   :  { %v959_v48 = vmul.f32 %v945_v45, %v919_v43  ;;  %v961_v49 = vmul.f32 %v945_v45, %v921_v44  ;;  %v1006_v60 = vshrl.u32 %v1005_v52, 7  ;;  %vm1044_vm4 = vcmp.lt.s32.totalorder %v1005_v52, 512 }
 0x2db   :  { %v960_v50 = vmul.f32 %v945_v45, %v920_v46  ;;  %v962_v51 = vmul.f32 %v945_v45, %v922_v47  ;;  %v1021_v16 = vunpack.c.0.s8 %v1020_v4 }
 0x2dc   :  { %v965_v53 = vadd.f32 %v964_v35, %v959_v48  ;;  %v983_v5 = vadd.f32 %v982_v36, %v961_v49  ;;  %v1007_v8 = vsub.s32 0, %v1006_v60 }
 0x2dd   :  { %v974_v54 = vadd.f32 %v973_v39, %v960_v50  ;;  %v992_v55 = vadd.f32 %v991_v40, %v962_v51  ;;  %v1024_v26 = vsub.s32 %v1021_v16, %v1006_v60 }
 0x2de   :  { %v966_v56 = vrot.slane %v965_v53, 4  ;;  %v984_v57 = vrot.slane %v983_v5, 4  ;;  %v1008_v19 = vrot.slane %v1003_v11, %v1007_v8 }
 0x2df   :  { %v975_v58 = vrot.slane %v974_v54, 4  ;;  %v993_v59 = vrot.slane %v992_v55, 4 }
 0x2e0   :  { %v967_v61 = vadd.f32 %v966_v56, %v965_v53  ;;  %v985_v62 = vadd.f32 %v984_v57, %v983_v5 }
 0x2e1   :  { %v976_v63 = vadd.f32 %v975_v58, %v974_v54  ;;  %v994_v0 = vadd.f32 %v993_v59, %v992_v55 }
 0x2e2   :  { %v968_v1 = vrot.slane %v967_v61, 2  ;;  %v986_v2 = vrot.slane %v985_v62, 2 }
 0x2e3   :  { %v977_v6 = vrot.slane %v976_v63, 2  ;;  %v995_v7 = vrot.slane %v994_v0, 2 }
 0x2e4   :  { %v969_v9 = vadd.f32 %v968_v1, %v967_v61  ;;  %v987_v10 = vadd.f32 %v986_v2, %v985_v62 }
 0x2e5   :  { %v978_v12 = vadd.f32 %v977_v6, %v976_v63  ;;  %v996_v13 = vadd.f32 %v995_v7, %v994_v0 }
 0x2e6   :  { %v970_v14 = vrot.slane %v969_v9, 1  ;;  %v988_v15 = vrot.slane %v987_v10, 1 }
 0x2e7   :  { %v979_v17 = vrot.slane %v978_v12, 1  ;;  %v997_v18 = vrot.slane %v996_v13, 1 }
 0x2e8   :  { %v971_v20 = vadd.f32 %v970_v14, %v969_v9  ;;  %v989_v21 = vadd.f32 %v988_v15, %v987_v10 }
 0x2e9   :  { %v980_v23 = vadd.f32 %v979_v17, %v978_v12  ;;  %v998_v24 = vadd.f32 %v997_v18, %v996_v13 }
 0x2ea   :  { %v1009_v25 = vadd.f32 %v1008_v19, %v971_v20  ;;  %v1011_v22 = vadd.f32 %v1008_v19, %v989_v21 }
 0x2eb   :  { %v1010_v27 = vadd.f32 %v1008_v19, %v980_v23  ;;  %v1012_v28 = vadd.f32 %v1008_v19, %v998_v24 }
 0x2ed   :  { %v1017_v29 = vcombine.low %v1009_v25, %v1010_v27  ;;  %v1018_v30 = vcombine.low %v1011_v22, %v1012_v28 }
 0x2ef   :  { %v1025_v31 = vrot.slane %v1017_v29, %v1024_v26  ;;  %v1032_v32 = vrot.slane %v1018_v30, %v1024_v26 }
 0x2f1   :  { %v1033_v33 = vcombine.low %v1025_v31, %v1032_v32 }
 0x2f3   :  { %v1040_v34 = vrot.slane %v1033_v33, %v1024_v26 }
 0x2f5   :  { %1046 = vst.msk [vmem:[#allocation3] sm:$0xf] %vm1044_vm4, %v1040_v34 }
 0x2f6   :  { %1164 = shalt.err (!%p1161_p4)
}
 0x2f7   :  { %s1165_s12 = scalar_lea.hbm %s1439_s9, 64 }
 0x2f8   :  { %p1166_p5 = scmp.ne.s32.totalorder %s1439_s9, %s1165_s12  ;;  %p1169_p6 = scmp.lt.u32.totalorder %s1165_s12, %s1439_s9 }
 0x2fa   :  { %p1171_p7 = pnand %p1169_p6, %p1166_p5 }
 0x2fc   :  { %1174 = shalt.err (!%p1171_p7)
}
 0x2fd   :  { %1056 = dma.vmem_to_hbm [thread:$0]  %s1054_s29, 64, %s1439_s9, [#allocation4]  }
 0x2fe   :  { %1175 = dma.done.wait [#allocation4], 64  }
 0x2ff   :  { %1176 = vsyncadd [#allocation4], 4294967232 }
 0x300   :  { %1060 = vsyncpa [#allocation4], 1 }

</bundles_post_ra>
